<compile_context>
chip_gen: v6e
topology: v6e:2x2x1
jax: 0.10.0
libtpu: 0.0.40
codegen_flags: <defaults>
</compile_context>

<pallas_src>
import functools

import jax
import jax.numpy as jnp
from jax import lax
from jax.experimental import pallas as pl
from jax.experimental.pallas import tpu as pltpu


# --------------------------------------------------------------------------
# Pallas kernel: fused separable bilinear warp + photometric epilogue
# --------------------------------------------------------------------------

def _warp_photo_kernel(cc, H_out,
                       gamma_ref, mult_ref, flag_ref,
                       wy_ref, wxt_ref, img_ref,
                       out_ref, t_ref):
    """One (batch, channel-chunk) tile.

    img_ref : (1, cc, H_in, W_in)   matmul dtype (bf16 by default)
    wy_ref  : (1, H_out, H_in)      row-interp hat weights   (resident per b)
    wxt_ref : (1, W_in, W_out)      col-interp hat weights^T (resident per b)
    out_ref : (1, cc, H_out, W_out) float32
    t_ref   : (cc*H_out, W_in)      scratch for the y-interpolated slab
    """
    b = pl.program_id(0)
    ci = pl.program_id(1)

    wy = wy_ref[0]       # (H_out, H_in)
    wxt = wxt_ref[0]     # (W_in, W_out)

    # Pass 1: row (y) interpolation per channel into a stacked scratch slab.
    # H_out is a multiple of 8 (checked in the wrapper), so every slice offset
    # c*H_out is sublane aligned.
    for c in range(cc):
        tc = jnp.dot(wy, img_ref[0, c], preferred_element_type=jnp.float32)
        t_ref[pl.ds(c * H_out, H_out), :] = tc.astype(t_ref.dtype)

    # Pass 2: column (x) interpolation as ONE batched MXU matmul over all cc
    # channels (M = cc * H_out fills the 256-row MXU on v6e/v7x).
    y_all = jnp.dot(t_ref[...].astype(wxt.dtype), wxt,
                    preferred_element_type=jnp.float32)    # (cc*H_out, W_out) f32
    for c in range(cc):
        out_ref[0, c] = y_all[c * H_out:(c + 1) * H_out, :]

    # Photometric epilogue clip((x**gamma) * mult, 0, 1): skipped entirely
    # (no EUP log/exp pushes, no selects) when the traced gate is off.
    @pl.when(flag_ref[0] != 0)
    def _():
        g = gamma_ref[b]
        for c in range(cc):
            yv = out_ref[0, c]
            m = mult_ref[b, ci * cc + c]
            pos = yv > 0.0
            safe = jnp.where(pos, yv, 1.0)
            powed = jnp.where(pos, jnp.exp(g * jnp.log(safe)), 0.0)  # x**g, 0**g == 0
            out_ref[0, c] = jnp.clip(powed * m, 0.0, 1.0)


def _pick_channel_chunk(B, C_total, H_in, W_in, itemsize,
                        max_block_bytes=8 << 20, min_steps=8):
    """Largest divisor of C_total whose input block fits the VMEM budget while
    (when possible) keeping >= min_steps grid steps to hide DMA (v7x 2-core)."""
    sub = max(8, 32 // itemsize)                    # per-channel sublane padding
    h_pad = -(-H_in // sub) * sub
    per_ch = h_pad * W_in * itemsize
    fits = [d for d in range(1, C_total + 1)
            if C_total % d == 0 and d * per_ch <= max_block_bytes]
    if not fits:
        return 1
    good = [d for d in fits if B * (C_total // d) >= min_steps]
    return max(good) if good else max(fits)


def warp_photo_pallas(gamma, mult, flag, w_y, w_xt, imgs, cc):
    B, C_total, H_in, W_in = imgs.shape
    H_out = w_y.shape[1]
    W_out = w_xt.shape[2]
    assert C_total % cc == 0
    assert H_out % 8 == 0, "resize height must be a multiple of 8"
    n_cc = C_total // cc

    mm_dtype = imgs.dtype
    in_item = jnp.dtype(mm_dtype).itemsize
    sub = max(8, 32 // in_item)
    # bf16 scratch halves VMEM; fall back to f32 if H_out is not 16-aligned.
    t_dtype = mm_dtype if H_out % sub == 0 else jnp.float32
    t_item = jnp.dtype(t_dtype).itemsize

    # VMEM budget estimate: double-buffered blocks + scratch + matmul temps.
    h_pad = -(-H_in // sub) * sub
    est = (2 * (cc * h_pad * W_in * in_item
                + cc * H_out * W_out * 4
                + H_out * h_pad * in_item
                + W_in * W_out * in_item)
           + cc * H_out * W_in * t_item
           + 3 * cc * H_out * W_out * 4)
    vmem_limit = int(min(max(32 << 20, est + (8 << 20)), 48 << 20))

    kern = functools.partial(_warp_photo_kernel, cc, H_out)
    return pl.pallas_call(
        kern,
        out_shape=jax.ShapeDtypeStruct((B, C_total, H_out, W_out), jnp.float32),
        grid=(B, n_cc),
        in_specs=[
            pl.BlockSpec(memory_space=pltpu.MemorySpace.SMEM),   # gamma (B,)
            pl.BlockSpec(memory_space=pltpu.MemorySpace.SMEM),   # mult  (B, C_total)
            pl.BlockSpec(memory_space=pltpu.MemorySpace.SMEM),   # flag  (1,)
            pl.BlockSpec((1, H_out, H_in), lambda b, ci: (b, 0, 0)),        # w_y
            pl.BlockSpec((1, W_in, W_out), lambda b, ci: (b, 0, 0)),        # w_xt
            pl.BlockSpec((1, cc, H_in, W_in), lambda b, ci: (b, ci, 0, 0)),  # imgs
        ],
        out_specs=pl.BlockSpec((1, cc, H_out, W_out), lambda b, ci: (b, ci, 0, 0)),
        scratch_shapes=[pltpu.VMEM((cc * H_out, W_in), t_dtype)],
        compiler_params=pltpu.CompilerParams(
            dimension_semantics=("parallel", "parallel"),
            vmem_limit_bytes=vmem_limit),
    )(gamma, mult, flag, w_y, w_xt, imgs)


# --------------------------------------------------------------------------
# Module wrapper (glue in plain JAX, hot path in the kernel above)
# --------------------------------------------------------------------------

class AugmentationSceneFlowPallas:
    def __init__(self, args, photometric=True, trans=0.07,
                 scale=(0.93, 1.0), resize=(128, 416),
                 mxu_bf16=True, max_block_bytes=8 << 20):
        self._args = args
        self._photometric = bool(photometric)
        self._min_scale, self._max_scale = scale
        self._max_trans = trans
        self._resize = list(resize)
        self._mxu_bf16 = bool(mxu_bf16)       # bf16 MXU path (default on)
        self._max_block_bytes = int(max_block_bytes)
        # PhotometricAugmentation ranges
        self._min_gamma, self._max_gamma = 0.8, 1.2
        self._min_brght, self._max_brght = 0.5, 2.0
        self._min_shift, self._max_shift = 0.8, 1.2
        # Whole forward is jitted: no host-side float()/bool() syncs.
        self._forward_jit = jax.jit(self._forward)

    # ---- hat-weight construction (hoisted out of the kernel) ----
    @staticmethod
    def _hat_weights(scale_x, scale_y, tx, ty, H_in, W_in, H_out, W_out, dtype):
        # Grid normalization (/dim * 2) mirrors calculate_tform_and_grids;
        # un-normalization ((g+1)/2*(dim-1)) mirrors grid_sample(align_corners=True);
        # the hat function implements padding_mode='zeros'.
        oi = jnp.arange(H_out, dtype=jnp.float32)
        hi = jnp.arange(H_in, dtype=jnp.float32)
        gy = (scale_y[:, None] * (oi[None, :] - (H_out - 1.0) / 2.0)
              + ty[:, None]) / float(H_in) * 2.0
        src_y = (gy + 1.0) * 0.5 * (H_in - 1.0)                       # (B, H_out)
        w_y = jnp.maximum(0.0, 1.0 - jnp.abs(src_y[:, :, None] - hi[None, None, :]))

        wi = jnp.arange(W_in, dtype=jnp.float32)
        oj = jnp.arange(W_out, dtype=jnp.float32)
        gx = (scale_x[:, None] * (oj[None, :] - (W_out - 1.0) / 2.0)
              + tx[:, None]) / float(W_in) * 2.0
        src_x = (gx + 1.0) * 0.5 * (W_in - 1.0)                       # (B, W_out)
        w_xt = jnp.maximum(0.0, 1.0 - jnp.abs(src_x[:, None, :] - wi[None, :, None]))
        return w_y.astype(dtype), w_xt.astype(dtype)

    # ---- coords output (tiny; plain JAX, matches torch (B,H,W,2) layout) ----
    @staticmethod
    def _coords(scale_x, scale_y, tx, ty, H_in, W_in, H_out, W_out):
        B = scale_x.shape[0]
        jj = jnp.arange(W_out, dtype=jnp.float32)
        ii = jnp.arange(H_out, dtype=jnp.float32)
        gx = (scale_x[:, None] * (jj[None, :] - (W_out - 1.0) / 2.0)
              + tx[:, None]) / float(W_in) * 2.0                      # (B, W_out)
        gy = (scale_y[:, None] * (ii[None, :] - (H_out - 1.0) / 2.0)
              + ty[:, None]) / float(H_in) * 2.0                      # (B, H_out)
        gxb = jnp.broadcast_to(gx[:, None, :], (B, H_out, W_out))
        gyb = jnp.broadcast_to(gy[:, :, None], (B, H_out, W_out))
        return jnp.stack([gxb, gyb], axis=-1)                         # (B,H,W,2)

    # ---- find_invalid (tiny 3x3-corner math) ----
    @staticmethod
    def _find_invalid(h, w, params):
        scale = params[:, 0:1]
        tx = params[:, 2:3]
        ty = params[:, 3:4]
        intm_h = jnp.floor(h * scale)
        intm_w = jnp.floor(w * scale)
        hf_h = (intm_h - 1.0) / 2.0
        hf_w = (intm_w - 1.0) / 2.0
        sx = jnp.array([1.0, 1.0, -1.0, -1.0], jnp.float32)[None, :]
        sy = jnp.array([1.0, -1.0, 1.0, -1.0], jnp.float32)[None, :]
        x_tf = sx * hf_w + tx
        y_tf = sy * hf_h + ty
        img_hf_h = (h - 1.0) / 2.0
        img_hf_w = (w - 1.0) / 2.0
        bad = ((x_tf <= -img_hf_w) | (y_tf <= -img_hf_h) |
               (x_tf >= img_hf_w) | (y_tf >= img_hf_h))
        return (jnp.sum(bad, axis=1, keepdims=True) > 0).astype(jnp.float32)

    # ---- rejection sampling of [scale, rot, tx, ty] as a traced while loop ----
    def _find_aug_params(self, key, batch, h, w):
        min_s, max_s, max_tr = self._min_scale, self._max_scale, self._max_trans

        def cond_fn(state):
            _, invalid, _ = state
            return jnp.sum(invalid) > 0.0

        def body_fn(state):
            params, invalid, k = state
            k, k1, k2, k3 = jax.random.split(k, 4)
            scale = jax.random.uniform(k1, (batch, 1), jnp.float32, min_s, max_s)
            max_t = jnp.minimum(1.0 - scale, max_tr) * 0.5
            tx = jax.random.uniform(k2, (batch, 1), jnp.float32, -1.0, 1.0) * max_t * w
            ty = jax.random.uniform(k3, (batch, 1), jnp.float32, -1.0, 1.0) * max_t * h
            params_new = jnp.concatenate(
                [scale, jnp.zeros_like(scale), tx, ty], axis=1)
            params = invalid * params_new + (1.0 - invalid) * params
            invalid = self._find_invalid(h, w, params)
            return params, invalid, k

        state = (jnp.zeros((batch, 4), jnp.float32),
                 jnp.ones((batch, 1), jnp.float32),
                 key)
        params, _, key = lax.while_loop(cond_fn, body_fn, state)
        return params, key

    # ---- intrinsics update (tiny (B,S,3,3)) ----
    def _augment_intrinsics(self, intr, scale_x, scale_y, tx, ty, h, w,
                            H_out, W_out):
        grid_ww = 0.0 - (W_out - 1.0) / 2.0
        grid_hh = 0.0 - (H_out - 1.0) / 2.0
        str_p_ww = scale_x * grid_ww + tx + w * 0.5   # (B,)
        str_p_hh = scale_y * grid_hh + ty + h * 0.5
        intr = intr.at[:, :, 0, 2].add(-str_p_ww[:, None])
        intr = intr.at[:, :, 1, 2].add(-str_p_hh[:, None])
        intr = intr.at[:, :, 0, 0].set(intr[:, :, 0, 0] / scale_x[:, None])
        intr = intr.at[:, :, 1, 1].set(intr[:, :, 1, 1] / scale_y[:, None])
        intr = intr.at[:, :, 0, 2].set(intr[:, :, 0, 2] / scale_x[:, None])
        intr = intr.at[:, :, 1, 2].set(intr[:, :, 1, 2] / scale_y[:, None])
        return intr

    def forward(self, example_dict, key):
        return self._forward_jit(example_dict, key)

    def _forward(self, example_dict, key):
        N = self._args.num_of_past_frames
        im_l = [example_dict['input_l%d' % (i + 1)] for i in range(N)]
        im_r = [example_dict['input_r%d' % (i + 1)] for i in range(N)]
        k_l = [example_dict['input_k_l%d' % (i + 1)] for i in range(N)]
        k_r = [example_dict['input_k_r%d' % (i + 1)] for i in range(N)]
        B, C, H, W = im_l[0].shape
        H_out, W_out = self._resize

        params, key = self._find_aug_params(key, B, float(H), float(W))
        scale = params[:, 0]
        tx = params[:, 2]
        ty = params[:, 3]
        intm_h = jnp.floor(H * scale)
        intm_w = jnp.floor(W * scale)
        scale_x = intm_w / float(W_out)
        scale_y = intm_h / float(H_out)

        coords = self._coords(scale_x, scale_y, tx, ty, H, W, H_out, W_out)

        mm_dtype = jnp.bfloat16 if self._mxu_bf16 else jnp.float32
        w_y, w_xt = self._hat_weights(scale_x, scale_y, tx, ty, H, W,
                                      H_out, W_out, mm_dtype)

        # All 2N images warped + photometrically augmented in ONE pallas call.
        # The concat fuses with the bf16 downcast (half-size HBM copy).
        # TODO(synk): pass the 2N images as separate pallas operands to remove
        # the concat copy entirely (extra HBM read/write at KITTI scale).
        imgs = jnp.concatenate(im_l + im_r, axis=1).astype(mm_dtype)
        C_total = imgs.shape[1]
        num_images = C_total // C

        # Photometric params drawn unconditionally; the 50% gate is a traced
        # int flag; pl.when inside the kernel skips the epilogue when off.
        key, kgate, kg, kb, ks = jax.random.split(key, 5)
        gate = jax.random.uniform(kgate, ()) > 0.5
        flag = jnp.logical_and(gate, self._photometric).astype(jnp.int32).reshape(1)
        gamma = jax.random.uniform(kg, (B,), jnp.float32,
                                   self._min_gamma, self._max_gamma)
        bright = jax.random.uniform(kb, (B, 1), jnp.float32,
                                    self._min_brght, self._max_brght)
        shift = jax.random.uniform(ks, (B, 3), jnp.float32,
                                   self._min_shift, self._max_shift)
        # Channel order matches torch: concat(im_l + im_r); shift repeats per
        # image (orig_c == 3 in the torch module; tiled/truncated for safety).
        rep = -(-C // 3)
        shift_c = jnp.tile(shift, (1, rep))[:, :C]                   # (B, C)
        mult = (bright * jnp.tile(shift_c, (1, num_images))).astype(jnp.float32)

        cc = _pick_channel_chunk(B, C_total, H, W,
                                 jnp.dtype(mm_dtype).itemsize,
                                 self._max_block_bytes)
        imgs_aug = warp_photo_pallas(gamma, mult, flag, w_y, w_xt, imgs, cc)

        # intrinsics
        intr = jnp.stack(k_l + k_r, axis=1).astype(jnp.float32)  # (B, 2N, 3, 3)
        intr = self._augment_intrinsics(intr, scale_x, scale_y, tx, ty,
                                        float(H), float(W), H_out, W_out)

        out = dict(example_dict)
        out['input_coords'] = coords
        out['input_aug_scale'] = params[:, 0:1]
        for i in range(N):
            il = imgs_aug[:, i * C:(i + 1) * C]
            ir = imgs_aug[:, (N + i) * C:(N + i + 1) * C]
            kl = intr[:, i]
            kr = intr[:, N + i]
            out['input_l%d_aug' % (i + 1)] = il
            out['input_r%d_aug' % (i + 1)] = ir
            out['input_k_l%d_aug' % (i + 1)] = kl
            out['input_k_r%d_aug' % (i + 1)] = kr
            out['input_k_l%d_flip_aug' % (i + 1)] = kl.at[:, 0, 2].set(
                float(W_out) - kl[:, 0, 2])
            out['input_k_r%d_flip_aug' % (i + 1)] = kr.at[:, 0, 2].set(
                float(W_out) - kr[:, 0, 2])
        aug_size = jnp.zeros_like(example_dict['input_size'])
        aug_size = aug_size.at[:, 0].set(float(H_out)).at[:, 1].set(float(W_out))
        out['aug_size'] = aug_size
        return out


# --------------------------------------------------------------------------
# Demo + numerics check
# --------------------------------------------------------------------------

if __name__ == "__main__":
    class Args:
        num_of_past_frames = 2

    B, C, H, W = 2, 3, 48, 160
    RESIZE = (32, 128)
    N = Args.num_of_past_frames

    # ---- standalone numerics check of the fused kernel vs plain-JAX ref ----
    Bc, Cc, Hc, Wc = 2, 6, 48, 160
    Ho, Wo = RESIZE
    kx = jax.random.split(jax.random.PRNGKey(1), 3)
    img_f32 = jax.random.uniform(kx[0], (Bc, Cc, Hc, Wc), jnp.float32)
    sxc = jnp.array([1.1, 0.9], jnp.float32)
    syc = jnp.array([1.2, 1.0], jnp.float32)
    txc = jnp.array([3.0, -2.0], jnp.float32)
    tyc = jnp.array([-1.5, 2.5], jnp.float32)
    gamma_c = jax.random.uniform(kx[1], (Bc,), jnp.float32, 0.8, 1.2)
    mult_c = jax.random.uniform(kx[2], (Bc, Cc), jnp.float32, 0.5, 2.0)
    flag_c = jnp.ones((1,), jnp.int32)
    wy_c, wxt_c = AugmentationSceneFlowPallas._hat_weights(
        sxc, syc, txc, tyc, Hc, Wc, Ho, Wo, jnp.bfloat16)
    cc_c = _pick_channel_chunk(Bc, Cc, Hc, Wc, 2)
    out_k = warp_photo_pallas(gamma_c, mult_c, flag_c, wy_c, wxt_c,
                              img_f32.astype(jnp.bfloat16), cc_c)
    wy32, wxt32 = AugmentationSceneFlowPallas._hat_weights(
        sxc, syc, txc, tyc, Hc, Wc, Ho, Wo, jnp.float32)
    t_ref = jnp.einsum('boh,bchw->bcow', wy32, img_f32)
    y_ref = jnp.einsum('bcow,bwj->bcoj', t_ref, wxt32)
    ref = jnp.clip(jnp.power(jnp.maximum(y_ref, 0.0),
                             gamma_c[:, None, None, None])
                   * mult_c[:, :, None, None], 0.0, 1.0)
    max_err = float(jnp.max(jnp.abs(out_k - ref)))
    assert max_err < 0.05, f"warp+photo kernel mismatch: {max_err}"

    # ---- full module forward ----
    key = jax.random.PRNGKey(0)
    keys = jax.random.split(key, 2 * N + 1)

    base_K = jnp.array([[100.0, 0.0, W / 2.0],
                        [0.0, 100.0, H / 2.0],
                        [0.0, 0.0, 1.0]], jnp.float32)

    example_dict = {}
    idx = 0
    for i in range(N):
        example_dict['input_l%d' % (i + 1)] = jax.random.uniform(
            keys[idx], (B, C, H, W), jnp.float32); idx += 1
        example_dict['input_r%d' % (i + 1)] = jax.random.uniform(
            keys[idx], (B, C, H, W), jnp.float32); idx += 1
        example_dict['input_k_l%d' % (i + 1)] = jnp.tile(base_K[None], (B, 1, 1))
        example_dict['input_k_r%d' % (i + 1)] = jnp.tile(base_K[None], (B, 1, 1))
    example_dict['input_size'] = jnp.tile(
        jnp.array([[float(H), float(W)]], jnp.float32), (B, 1))

    aug = AugmentationSceneFlowPallas(Args(), photometric=True, resize=RESIZE)
    out = aug.forward(example_dict, keys[idx])
    jax.block_until_ready(out)

    assert out['input_l1_aug'].shape == (B, C, RESIZE[0], RESIZE[1])
    assert out['input_r%d_aug' % N].shape == (B, C, RESIZE[0], RESIZE[1])
    assert out['input_coords'].shape == (B, RESIZE[0], RESIZE[1], 2)
    assert out['input_k_l1_aug'].shape == (B, 3, 3)
    assert bool(jnp.isfinite(out['input_l1_aug']).all())
    assert bool(jnp.isfinite(out['input_coords']).all())

    # Second call with a different key reuses the same jitted executable.
    out2 = aug.forward(example_dict, jax.random.PRNGKey(7))
    jax.block_until_ready(out2)

    print("KERNEL_OK")
</pallas_src>

<mosaic_0001>
module attributes {stable_mosaic.version = 11 : i64} {
  func.func @_warp_photo_kernel(%arg0: i32, %arg1: i32, %arg2: memref<2xf32, #tpu.memory_space<smem>>, %arg3: memref<2x6xf32, #tpu.memory_space<smem>>, %arg4: memref<1xi32, #tpu.memory_space<smem>>, %arg5: memref<1x32x48xbf16, #tpu.memory_space<vmem>>, %arg6: memref<1x160x128xbf16, #tpu.memory_space<vmem>>, %arg7: memref<1x1x48x160xbf16, #tpu.memory_space<vmem>>, %arg8: memref<1x1x32x128xf32, #tpu.memory_space<vmem>>, %arg9: memref<32x160xbf16, #tpu.memory_space<vmem>>) attributes {dimension_semantics = [#tpu.dimension_semantics<parallel>, #tpu.dimension_semantics<parallel>], iteration_bounds = array<i64: 2, 6>, scalar_prefetch = 0 : i64, scratch_operands = 1 : i64, tpu.core_type = #tpu.core_type<tc>, window_params = [{transform_indices = @transform_0, window_bounds = array<i64: 2>}, {transform_indices = @transform_1, window_bounds = array<i64: 2, 6>}, {transform_indices = @transform_2, window_bounds = array<i64: 1>}, {transform_indices = @transform_3, window_bounds = array<i64: 1, 32, 48>}, {transform_indices = @transform_4, window_bounds = array<i64: 1, 160, 128>}, {transform_indices = @transform_5, window_bounds = array<i64: 1, 1, 48, 160>}, {transform_indices = @transform_6, window_bounds = array<i64: 1, 1, 32, 128>}]} {
    %c0 = arith.constant 0 : index
    %c0_0 = arith.constant 0 : index
    %c0_1 = arith.constant 0 : index
    %0 = vector.load %arg5[%c0, %c0_0, %c0_1] : memref<1x32x48xbf16, #tpu.memory_space<vmem>>, vector<1x32x48xbf16>
    %1 = vector.shape_cast %0 : vector<1x32x48xbf16> to vector<32x48xbf16>
    %c0_2 = arith.constant 0 : index
    %c0_3 = arith.constant 0 : index
    %c0_4 = arith.constant 0 : index
    %2 = vector.load %arg6[%c0_2, %c0_3, %c0_4] : memref<1x160x128xbf16, #tpu.memory_space<vmem>>, vector<1x160x128xbf16>
    %3 = vector.shape_cast %2 : vector<1x160x128xbf16> to vector<160x128xbf16>
    %c0_5 = arith.constant 0 : index
    %c0_6 = arith.constant 0 : index
    %c0_7 = arith.constant 0 : index
    %c0_8 = arith.constant 0 : index
    %4 = vector.load %arg7[%c0_5, %c0_6, %c0_7, %c0_8] : memref<1x1x48x160xbf16, #tpu.memory_space<vmem>>, vector<1x1x48x160xbf16>
    %5 = vector.shape_cast %4 : vector<1x1x48x160xbf16> to vector<48x160xbf16>
    %cst = arith.constant dense<0.000000e+00> : vector<32x160xf32>
    %6 = tpu.matmul %1, %5, %cst {dimension_numbers = #tpu.dot_dimension_numbers<[1], [0], [0], [1], [0, 0, 1, 1], [], []>} : vector<32x48xbf16>, vector<48x160xbf16>, vector<32x160xf32> -> vector<32x160xf32>
    %7 = arith.truncf %6 : vector<32x160xf32> to vector<32x160xbf16>
    %c0_9 = arith.constant 0 : index
    %c0_10 = arith.constant 0 : index
    %8 = vector.load %arg9[%c0_9, %c0_10] : memref<32x160xbf16, #tpu.memory_space<vmem>>, vector<32x160xbf16>
    tpu.vector_store %arg9[%c0_9, %c0_10], %7 {strides = array<i32>} : memref<32x160xbf16, #tpu.memory_space<vmem>>, vector<32x160xbf16>,
    %c0_11 = arith.constant 0 : index
    %c0_12 = arith.constant 0 : index
    %9 = vector.load %arg9[%c0_11, %c0_12] : memref<32x160xbf16, #tpu.memory_space<vmem>>, vector<32x160xbf16>
    %cst_13 = arith.constant dense<0.000000e+00> : vector<32x128xf32>
    %10 = tpu.matmul %9, %3, %cst_13 {dimension_numbers = #tpu.dot_dimension_numbers<[1], [0], [0], [1], [0, 0, 1, 1], [], []>} : vector<32x160xbf16>, vector<160x128xbf16>, vector<32x128xf32> -> vector<32x128xf32>
    %c0_14 = arith.constant 0 : index
    %c0_15 = arith.constant 0 : index
    %c0_16 = arith.constant 0 : index
    %c0_17 = arith.constant 0 : index
    %11 = vector.load %arg8[%c0_14, %c0_15, %c0_16, %c0_17] : memref<1x1x32x128xf32, #tpu.memory_space<vmem>>, vector<1x1x32x128xf32>
    %12 = vector.shape_cast %11 : vector<1x1x32x128xf32> to vector<32x128xf32>
    %13 = vector.shape_cast %10 : vector<32x128xf32> to vector<1x1x32x128xf32>
    tpu.vector_store %arg8[%c0_14, %c0_15, %c0_16, %c0_17], %13 {strides = array<i32>} : memref<1x1x32x128xf32, #tpu.memory_space<vmem>>, vector<1x1x32x128xf32>,
    %c0_18 = arith.constant 0 : index
    %14 = memref.load %arg4[%c0_18] : memref<1xi32, #tpu.memory_space<smem>>
    %c0_i32 = arith.constant 0 : i32
    %15 = arith.cmpi ne, %14, %c0_i32 : i32
    %16 = arith.extui %15 : i1 to i32
    %c0_i32_19 = arith.constant 0 : i32
    %17 = arith.cmpi ne, %16, %c0_i32_19 : i32
    scf.if %17 {
      %18 = arith.index_cast %arg0 : i32 to index
      %19 = memref.load %arg2[%18] : memref<2xf32, #tpu.memory_space<smem>>
      %c0_20 = arith.constant 0 : index
      %c0_21 = arith.constant 0 : index
      %c0_22 = arith.constant 0 : index
      %c0_23 = arith.constant 0 : index
      %20 = vector.load %arg8[%c0_20, %c0_21, %c0_22, %c0_23] : memref<1x1x32x128xf32, #tpu.memory_space<vmem>>, vector<1x1x32x128xf32>
      %21 = vector.shape_cast %20 : vector<1x1x32x128xf32> to vector<32x128xf32>
      %c1_i32 = arith.constant 1 : i32
      %22 = arith.muli %arg1, %c1_i32 : i32
      %c0_i32_24 = arith.constant 0 : i32
      %23 = arith.addi %22, %c0_i32_24 : i32
      %24 = arith.index_cast %arg0 : i32 to index
      %25 = arith.index_cast %23 : i32 to index
      %26 = memref.load %arg3[%24, %25] : memref<2x6xf32, #tpu.memory_space<smem>>
      %cst_25 = arith.constant 0.000000e+00 : f32
      %27 = vector.broadcast %cst_25 : f32 to vector<32x128xf32>
      %28 = arith.cmpf ogt, %21, %27 : vector<32x128xf32>
      %cst_26 = arith.constant 1.000000e+00 : f32
      %29 = vector.broadcast %cst_26 : f32 to vector<32x128xf32>
      %30 = arith.select %28, %21, %29 : vector<32x128xi1>, vector<32x128xf32>
      %31 = math.log %30 : vector<32x128xf32>
      %32 = vector.broadcast %19 : f32 to vector<32x128xf32>
      %33 = arith.mulf %32, %31 : vector<32x128xf32>
      %34 = math.exp %33 : vector<32x128xf32>
      %cst_27 = arith.constant 0.000000e+00 : f32
      %35 = vector.broadcast %cst_27 : f32 to vector<32x128xf32>
      %36 = arith.select %28, %34, %35 : vector<32x128xi1>, vector<32x128xf32>
      %37 = vector.broadcast %26 : f32 to vector<32x128xf32>
      %38 = arith.mulf %36, %37 : vector<32x128xf32>
      %cst_28 = arith.constant 0.000000e+00 : f32
      %cst_29 = arith.constant 1.000000e+00 : f32
      %39 = vector.broadcast %cst_28 : f32 to vector<32x128xf32>
      %40 = arith.maximumf %39, %38 : vector<32x128xf32>
      %41 = vector.broadcast %cst_29 : f32 to vector<32x128xf32>
      %42 = arith.minimumf %41, %40 : vector<32x128xf32>
      %c0_30 = arith.constant 0 : index
      %c0_31 = arith.constant 0 : index
      %c0_32 = arith.constant 0 : index
      %c0_33 = arith.constant 0 : index
      %43 = vector.load %arg8[%c0_30, %c0_31, %c0_32, %c0_33] : memref<1x1x32x128xf32, #tpu.memory_space<vmem>>, vector<1x1x32x128xf32>
      %44 = vector.shape_cast %43 : vector<1x1x32x128xf32> to vector<32x128xf32>
      %45 = vector.shape_cast %42 : vector<32x128xf32> to vector<1x1x32x128xf32>
      tpu.vector_store %arg8[%c0_30, %c0_31, %c0_32, %c0_33], %45 {strides = array<i32>} : memref<1x1x32x128xf32, #tpu.memory_space<vmem>>, vector<1x1x32x128xf32>,
    } else {
    }
    return
  }
  func.func @transform_0(%arg0: i32, %arg1: i32) -> i32 {
    %c0_i32 = arith.constant 0 : i32
    %c0_i32_0 = arith.constant 0 : i32
    return %c0_i32 : i32
  }
  func.func @transform_1(%arg0: i32, %arg1: i32) -> (i32, i32) {
    %c0_i32 = arith.constant 0 : i32
    %c0_i32_0 = arith.constant 0 : i32
    %c0_i32_1 = arith.constant 0 : i32
    return %c0_i32, %c0_i32_0 : i32, i32
  }
  func.func @transform_2(%arg0: i32, %arg1: i32) -> i32 {
    %c0_i32 = arith.constant 0 : i32
    %c0_i32_0 = arith.constant 0 : i32
    return %c0_i32 : i32
  }
  func.func @transform_3(%arg0: i32, %arg1: i32) -> (i32, i32, i32) {
    %c0_i32 = arith.constant 0 : i32
    %c0_i32_0 = arith.constant 0 : i32
    %c0_i32_1 = arith.constant 0 : i32
    return %arg0, %c0_i32, %c0_i32_0 : i32, i32, i32
  }
  func.func @transform_4(%arg0: i32, %arg1: i32) -> (i32, i32, i32) {
    %c0_i32 = arith.constant 0 : i32
    %c0_i32_0 = arith.constant 0 : i32
    %c0_i32_1 = arith.constant 0 : i32
    return %arg0, %c0_i32, %c0_i32_0 : i32, i32, i32
  }
  func.func @transform_5(%arg0: i32, %arg1: i32) -> (i32, i32, i32, i32) {
    %c0_i32 = arith.constant 0 : i32
    %c0_i32_0 = arith.constant 0 : i32
    %c0_i32_1 = arith.constant 0 : i32
    return %arg0, %arg1, %c0_i32, %c0_i32_0 : i32, i32, i32, i32
  }
  func.func @transform_6(%arg0: i32, %arg1: i32) -> (i32, i32, i32, i32) {
    %c0_i32 = arith.constant 0 : i32
    %c0_i32_0 = arith.constant 0 : i32
    %c0_i32_1 = arith.constant 0 : i32
    return %arg0, %arg1, %c0_i32, %c0_i32_0 : i32, i32, i32, i32
  }
}

</mosaic_0001>

<bundles_post_ra>
// kernel: tpu_custom_call.1
= control target key start
LH: loop header
LB: loop body
LE: loop exit
PB: predicated region body
PF: predicated region fallthrough
CT: control target
= control target key end

     0   :  { %s1850_s0 = inlined_call_operand.vmem [shape: f32[2], index: 0, kind: input, shape index: {}]   ;;  %s1851_s1 = inlined_call_operand.vmem [shape: f32[2,6], index: 1, kind: input, shape index: {}]   ;;  %s1852_s2 = inlined_call_operand.<no memory space> [shape: s32[1], index: 2, kind: input, shape index: {}]   ;;  %s1853_s3 = inlined_call_operand.hbm [shape: bf16[2,32,48], index: 3, kind: input, shape index: {}]   ;;  %s1854_s4 = inlined_call_operand.hbm [shape: bf16[2,160,128], index: 4, kind: input, shape index: {}]   ;;  %s1855_s5 = inlined_call_operand.hbm [shape: bf16[2,6,48,160], index: 5, kind: input, shape index: {}]   ;;  %s1856_s6 = inlined_call_operand.hbm [shape: f32[2,6,32,128], index: 6, kind: output, shape index: {}]  }
   0x1   :  { %1877 = sst [smem:[#allocation26_spill]] %s1850_s0 }
   0x2   :  { %1878 = sst [smem:[#allocation27_spill]] %s1851_s1 }
   0x3   :  { %1879 = sst [smem:[#allocation28_spill]] %s1853_s3 }
   0x4   :  { %1880 = sst [smem:[#allocation29_spill]] %s1854_s4 }
   0x5   :  { %1881 = sst [smem:[#allocation30_spill]] %s1856_s6 }
   0x6   :  { %11 = sst [smem:[#allocation3]] %s1852_s2 }
   0x7   :  { %12 = vsyncpa [#allocation7], 0 }
   0x8   :  { %13 = vsyncpa [#allocation9], 0 }
   0x9   :  { %14 = vsyncpa [#allocation5], 0 }
   0xa   :  { %16 = vsyncpa [#allocation5 + $0x1], 0 }
   0xb   :  { %17 = vsyncpa [#allocation12], 0 }
   0xc   :  { %19 = vsyncpa [#allocation12 + $0x1], 0 }
   0xd   :  { %20 = vsyncpa [#allocation6], 0 }
   0xe   :  { %22 = vsyncpa [#allocation6 + $0x1], 0  ;;  %s1488_s23 = smov 0   ;;  %s1490_s24 = smov 0  }
   0xf   :  { %s1492_s25 = smov 0   ;;  %s1494_s26 = smov 0  }
  0x10   :  { %s1496_s27 = smov 0   ;;  %s1498_s28 = smov 0  }
  0x11   :  { %s1500_s2 = smov 0   ;;  %s1502_s29 = smov 0  }
  0x12   :  { %s1504_s30 = smov 0   ;;  %s1506_s7 = smov 0  }
  0x13   :  { %s1508_s8 = smov 0  }
  0x14 LB: > { %1882 = sst [smem:[#allocation21_spill]] %s1395_s23  ;;  %p117_p0 = scmp.ne.s32.totalorder %s1415_s28, %s1411_s27  ;;  %s1435_s8 = sphi %s1508_s8, %s28_s8   ;;  %s1431_s7 = sphi %s1506_s7, %s1935_s7   ;;  %s1427_s30 = sphi %s1504_s30, %s1934_s30   ;;  %s1423_s29 = sphi %s1502_s29, %s1933_s29   ;;  %s1419_s2 = sphi %s1500_s2, %s1932_s2   ;;  %s1415_s28 = sphi %s1498_s28, %s1931_s28   ;;  %s1411_s27 = sphi %s1496_s27, %s1930_s27   ;;  %s1407_s26 = sphi %s1494_s26, %s1929_s26   ;;  %s1403_s25 = sphi %s1492_s25, %s1928_s25   ;;  %s1399_s24 = sphi %s1490_s24, %s1927_s24   ;;  %s1395_s23 = sphi %s1488_s23, %s1926_s23  }
  0x15   : > { %1883 = sst [smem:[#allocation22_spill]] %s1419_s2  ;;  %p118_p1 = scmp.eq.s32.totalorder %s1435_s8, 0 }
  0x16   : > { %1884 = sst [smem:[#allocation23_spill]] %s1435_s8  ;;  %p1859_p2 = scmp.lt.s32.totalorder %s1435_s8, 12 }
  0x17   : > { %s1549_s10 = sand.u32 1, %s1415_s28   ;;  %p119_p3 = por %p118_p1, %p117_p0 }
  0x18   : > { %s275_s11 = sand.u32 1, %s1435_s8   ;;  %s994_s13 = smul.u32 80, %s1549_s10 }
  0x19   : > { %p1556_p4 = pnand %p1859_p2, %p119_p3  ;;  %s995_s14 = smul.u32 1280, %s1431_s7 }
  0x1a   : > { %s1886_s4 = sld [smem:[#allocation29_spill]]  ;;  %s279_s18 = scalar_lea.vmem [#allocation11], %s994_s13 }
  0x1b   : > { %s1885_s12 = scalar_select %p1556_p4, 1, 0 }
  0x1c   : > { %s286_s19 = sshll.u32 %s279_s18, 4  ;;  %s1565_s20 = scalar_lea.sflag [#allocation12], %s275_s11  ;;  %s287_s19 = int_to_ptr.vmem [resolvable:$true] %s286_s19 }
  0x1d   : > { %p1858_p5 = pneg %p1556_p4  ;;  %s1198_s21 = scalar_lea.vmem %s287_s19, 1280 }
  0x1e   : > { %p1199_p6 = scmp.ne.s32.totalorder %s287_s19, %s1198_s21  ;;  %s1437_s22 = smov [#allocation11]  }
  0x1f   : > { %s1203_s9 = sshll.u32 %s1437_s22, 4  ;;  %s1204_s9 = int_to_ptr.vmem [resolvable:$false] %s1203_s9 }
  0x20   : > { %s285_s17 = scalar_lea.hbm %s1886_s4, %s995_s14  ;;  %p1201_p7 = pnand %p1199_p6, %p1858_p5 }
  0x21   : > { %s1205_s6 = scalar_lea.vmem %s1204_s9, 2560  ;;  %p1206_p9 = scmp.lt.s32.totalorder %s287_s19, %s1204_s9 }
  0x22   : > { %p1202_p8 = pneg %p1201_p7  ;;  %p1207_p10 = scmp.lt.s32.totalorder %s1205_s6, %s1198_s21 }
  0x24   : > { %p1208_p11 = por %p1207_p10, %p1206_p9 }
  0x26   : > { %p1209_p12 = pnand %p1208_p11, %p1202_p8 }
  0x28   : > { %1212 = shalt.err (!%p1209_p12)
}
  0x29   : > { %s1861_s13 = smov 64   ;;  %s1862_s11 = smov 4  }
  0x2a   : > { %1031 = dma.hbm_to_vmem [thread:$0]  (!%p1556_p4), %s285_s17, 1280, %s287_s19, %s1565_s20, %s1861_s13, %s1861_s13, %s1862_s11  }
  0x2b   : > { %s1579_s6 = sadd.s32 4294967295, %s1435_s8   ;;  %s937_s9 = sadd.s32 4294967294, %s1435_s8  }
  0x2c   : > { %p123_p13 = scmp.ne.s32.totalorder %s1411_s27, %s1407_s26  ;;  %p1865_p0 = scmp.eq.s32.totalorder %s1579_s6, 0 }
  0x2d   : > { %p171_p3 = scmp.ne.s32.totalorder %s1403_s25, %s1399_s24  ;;  %p177_p6 = scmp.ne.s32.totalorder %s1399_s24, %s1395_s23 }
  0x2e   : > { %p1592_p7 = por %p1865_p0, %p123_p13  ;;  %p203_p8 = scmp.eq.s32.totalorder %s1579_s6, 11 }
  0x2f   : > { %p173_p9 = por %p171_p3, %p118_p1  ;;  %p1601_p10 = por %p177_p6, %p1865_p0 }
  0x30   : > { %s1887_s15 = scalar_select %p1592_p7, 1, 0 }
  0x31   : > { %s1888_s16 = scalar_select %p1601_p10, 1, 0 }
  0x32   : > { %p1605_p11 = por %p203_p8, %p171_p3  ;;  %p209_p12 = scmp.eq.s32.totalorder %s937_s9, 11 }
  0x33   : > { %p938_p5 = scmp.ge.s32.totalorder %s1435_s8, 1  ;;  %p216_p2 = scmp.lt.s32.totalorder %s1435_s8, 13 }
  0x34   : > { %s1889_s26 = scalar_select %p1605_p11, 1, 0 }
  0x35   : > { %p1611_p13 = por %p209_p12, %p177_p6  ;;  %p1615_p7 = pnand %p938_p5, %p216_p2 }
  0x36   : > { %1890 = sst [smem:[#allocation24_spill]] %s1889_s26  ;;  %p1895_p3 = scmp.lt.s32.totalorder %s1435_s8, 12 }
  0x37   : > { %s1891_s17 = scalar_select %p1611_p13, 1, 0 }
  0x38   : > { %s1893_s18 = scalar_select %p1615_p7, 1, 0 }
  0x39   : > { %1892 = sst [smem:[#allocation25_spill]] %s1891_s17  ;;  %p1018_p1 = pneg %p1615_p7 }
  0x3a   : > { %s1894_s0 = sld [smem:[#allocation26_spill]]  ;;  %p1626_p8 = pnand %p1895_p3, %p173_p9 }
  0x3b   : > { %s1897_s1 = sld [smem:[#allocation27_spill]]  ;;  %p1635_p2 = pnand %p1018_p1, %p1865_p0 }
  0x3c   : > { %s1896_s9 = scalar_select %p1626_p8, 1, 0 }
  0x3d   : > { %s942_s19 = sshll.u32 %s1549_s10, 4  ;;  %p1215_p6 = pneg %p1635_p2 }
  0x40   : > { %s229_s22 = sshll.u32 %s1894_s0, 4  ;;  %s230_s22 = int_to_ptr.vmem [resolvable:$true] %s229_s22 }
  0x41   : > { %s240_s11 = sshll.u32 %s1897_s1, 4  ;;  %s1213_s21 = scalar_lea.vmem %s230_s22, 16  ;;  %s241_s11 = int_to_ptr.vmem [resolvable:$true] %s240_s11 }
  0x42   : > { %p1214_p5 = scmp.ne.s32.totalorder %s230_s22, %s1213_s21  ;;  %p1221_p3 = scmp.lt.s32.totalorder %s230_s22, %s230_s22 }
  0x43   : > { %p1222_p13 = scmp.lt.s32.totalorder %s1213_s21, %s1213_s21 }
  0x44   : > { %p1216_p9 = pnand %p1215_p6, %p1214_p5 }
  0x45   : > { %p1223_p11 = por %p1222_p13, %p1221_p3 }
  0x46   : > { %p1217_p12 = pneg %p1216_p9 }
  0x48   : > { %p1224_p10 = pnand %p1223_p11, %p1217_p12 }
  0x4a   : > { %1227 = shalt.err (!%p1224_p10)
}
  0x4b   : > { %s1440_s13 = smov [#allocation4]   ;;  %s1228_s14 = scalar_lea.vmem %s241_s11, 32 }
  0x4c   : > { %1021 = dma.vmem_to_smem (!%p1635_p2), %s230_s22, 16, %s1440_s13, [#allocation7]  }
  0x4d   : > { %p1229_p1 = scmp.ne.s32.totalorder %s241_s11, %s1228_s14  ;;  %p1236_p8 = scmp.lt.s32.totalorder %s241_s11, %s241_s11 }
  0x4e   : > { %p1237_p4 = scmp.lt.s32.totalorder %s1228_s14, %s1228_s14 }
  0x4f   : > { %p1231_p0 = pnand %p1229_p1, %p1215_p6 }
  0x50   : > { %p1238_p5 = por %p1237_p4, %p1236_p8 }
  0x51   : > { %p1232_p7 = pneg %p1231_p0 }
  0x53   : > { %p1239_p9 = pnand %p1238_p5, %p1232_p7 }
  0x55   : > { %1242 = shalt.err (!%p1239_p9)
}
  0x56   : > { %s1441_s0 = smov [#allocation8]   ;;  %s989_s21 = sshll.u32 %s1431_s7, 8 }
  0x57   : > { %1024 = dma.vmem_to_smem (!%p1635_p2), %s241_s11, 32, %s1441_s0, [#allocation9]  }
  0x58   : > { %s1899_s3 = sld [smem:[#allocation28_spill]]  ;;  %s258_s13 = scalar_lea.vmem [#allocation10], %s942_s19 }
  0x59   : > { %s265_s23 = sshll.u32 %s258_s13, 4  ;;  %s255_s8 = scalar_lea.sflag [#allocation5], %s1549_s10  ;;  %s266_s23 = int_to_ptr.vmem [resolvable:$true] %s265_s23 }
  0x5a   : > { %s1256_s14 = scalar_lea.vmem %s266_s23, 256  ;;  %p1900_p0 = scmp.ne.s32.totalorder %s1885_s12, 0 }
  0x5b   : > { %p1257_p4 = scmp.ne.s32.totalorder %s266_s23, %s1256_s14  ;;  %s1442_s4 = smov [#allocation10]  }
  0x5c   : > { %p1901_p7 = pneg %p1900_p0  ;;  %s1261_s26 = sshll.u32 %s1442_s4, 4  ;;  %s1262_s26 = int_to_ptr.vmem [resolvable:$false] %s1261_s26 }
  0x5d   : > { %s1263_s2 = scalar_lea.vmem %s1262_s26, 512  ;;  %p1264_p13 = scmp.lt.s32.totalorder %s266_s23, %s1262_s26 }
  0x5e   : > { %s264_s22 = scalar_lea.hbm %s1899_s3, %s989_s21  ;;  %p1259_p10 = pnand %p1257_p4, %p1901_p7 }
  0x5f   : > { %p1265_p8 = scmp.lt.s32.totalorder %s1263_s2, %s1256_s14 }
  0x60   : > { %p1260_p11 = pneg %p1259_p10 }
  0x61   : > { %p1266_p2 = por %p1265_p8, %p1264_p13 }
  0x63   : > { %p1267_p6 = pnand %p1266_p2, %p1260_p11 }
  0x65   : > { %1270 = shalt.err (!%p1267_p6)
}
  0x66   : > { %s1902_s0 = smov 4   ;;  %s1903_s1 = smov 64  }
  0x67   : > { %1028 = dma.hbm_to_vmem [thread:$0]  (!%p1900_p0), %s264_s22, 256, %s266_s23, %s255_s8, %s1903_s1, %s1903_s1, %s1902_s0  }
  0x68   : > { %s40_s10 = sadd.s32 1, %s1431_s7  ;;  %s37_s11 = sadd.s32 1, %s1427_s30 }
  0x69   : > { %s298_s2 = sand.u32 1, %s1403_s25   ;;  %p38_p12 = scmp.ge.s32.totalorder %s37_s11, 6 }
  0x6a   : > { %s996_s26 = smul.u32 48, %s298_s2  ;;  %s1904_s2 = sadd.s32 1, %s1415_s28 }
  0x6b   : > { %s997_s17 = smul.u32 12, %s1427_s30  ;;  %s1937_s11 = smov (%p38_p12, %s37_s11), 0 }
  0x6c   : > { %s1939_s10 = smov (!%p38_p12, %s40_s10), %s1431_s7  ;;  %s160_s12 = ssub.s32 %s1427_s30, %s1937_s11 }
  0x6d   : > { %p42_p3 = scmp.ge.s32.totalorder %s1939_s10, 2  ;;  %s998_s19 = smul.u32 72, %s1431_s7 }
  0x6e   : > { %s300_s23 = scalar_lea.vmem [#allocation13], %s996_s26  ;;  %p1906_p9 = scmp.ne.s32.totalorder %s1896_s9, 0 }
  0x6f   : > { %s309_s8 = sshll.u32 %s300_s23, 4  ;;  %s1941_s10 = smov (%p42_p3, %s1939_s10), 0  ;;  %s1671_s8 = int_to_ptr.vmem [resolvable:$true] %s309_s8 }
  0x70   : > { %s306_s21 = sadd.s32 %s998_s19, %s997_s17  ;;  %s107_s22 = ssub.s32 %s1431_s7, %s1941_s10 }
  0x71   : > { %s946_s13 = sshll.u32 %s306_s21, 6  ;;  %p108_p1 = scmp.eq.s32.totalorder %s107_s22, 0 }
  0x72   : > { %s161_s14 = sor.u32 %s160_s12, %s107_s22  ;;  %s308_s1 = scalar_lea.hbm %s1855_s5, %s946_s13 }
  0x73   : > { %p162_p5 = scmp.eq.s32.totalorder %s161_s14, 0  ;;  %s1905_s23 = sadd.s32 1, %s1403_s25 }
  0x74   : > { %s1681_s26 = scalar_select %p108_p1, %s1415_s28, %s1904_s2  }
  0x75   : > { %s1686_s3 = scalar_select %p162_p5, %s1403_s25, %s1905_s23  }
  0x76   : > { %p1273_p4 = pneg %p1906_p9  ;;  %s1284_s17 = scalar_lea.vmem %s1671_s8, 768 }
  0x77   : > { %p1285_p0 = scmp.ne.s32.totalorder %s1671_s8, %s1284_s17  ;;  %s1443_s19 = smov [#allocation13]  }
  0x78   : > { %s1289_s21 = sshll.u32 %s1443_s19, 4  ;;  %s1290_s21 = int_to_ptr.vmem [resolvable:$false] %s1289_s21 }
  0x79   : > { %p1287_p7 = pnand %p1285_p0, %p1273_p4  ;;  %s1291_s12 = scalar_lea.vmem %s1290_s21, 1536 }
  0x7a   : > { %p1292_p11 = scmp.lt.s32.totalorder %s1671_s8, %s1290_s21  ;;  %p1293_p13 = scmp.lt.s32.totalorder %s1291_s12, %s1284_s17 }
  0x7b   : > { %p1288_p10 = pneg %p1287_p7 }
  0x7c   : > { %p1294_p8 = por %p1293_p13, %p1292_p11 }
  0x7e   : > { %p1295_p2 = pnand %p1294_p8, %p1288_p10 }
  0x80   : > { %1298 = shalt.err (!%p1295_p2)
}
  0x81   : > { %s1444_s22 = smov 128   ;;  %s1445_s13 = smov 8  }
  0x82   : > { %1034 = dma.hbm_to_vmem [thread:$0]  (!%p1906_p9), %s308_s1, 768, %s1671_s8, %s1565_s20, %s1444_s22, %s1444_s22, %s1445_s13  }
  0x83   : > { %p1907_p6 = scmp.ne.s32.totalorder %s1893_s18, 0 }
  0x84   : > { %p1908_p12 = scmp.eq.s32.totalorder (!%p1907_p6), %s1579_s6, 0 }
  0x85   : > { %321 = sbr.rel (%p1907_p6) target bundleno = 667 (0x29b), region = 44 }
  0x8a   : > { %1370 = dma.done.wait (%p1908_p12), [#allocation7], 16   ;;  %p1909_p3 = pmov %p1908_p12 }
  0x8c   : > { %1372 = vsyncadd (%p1909_p3), [#allocation7], 4294967280  ;;  %p1910_p1 = pmov %p1909_p3 }
  0x8e   : > { %1374 = dma.done.wait (%p1910_p1), [#allocation9], 32   ;;  %p1911_p5 = pmov %p1910_p1 }
  0x8f   : > { %s331_s14 = sand.u32 1, %s1411_s27   ;;  %p1912_p9 = scmp.ne.s32.totalorder %s1887_s15, 0 }
  0x90   : > { %1376 = vsyncadd (%p1911_p5), [#allocation9], 4294967264  ;;  %s950_s9 = sshll.u32 %s331_s14, 4  ;;  %s332_s20 = scalar_lea.sflag [#allocation5], %s331_s14 }
  0x91   : > { %s1708_s8 = scalar_lea.vmem [#allocation10], %s950_s9 }
  0x92   : > { %1378 = dma.done.wait (%p1912_p9), %s332_s20, 256  }
  0x93   : > { %1380 = vsyncadd (%p1912_p9), %s332_s20, 4294967040  ;;  %s340_s18 = sand.u32 1, %s1579_s6   ;;  %s999_s4 = smul.u32 80, %s331_s14 }
  0x94   : > { %s341_s0 = scalar_lea.sflag [#allocation12], %s340_s18 }
  0x95   : > { %s1715_s1 = scalar_lea.vmem [#allocation11], %s999_s4 }
  0x96   : > { %1382 = dma.done.wait (%p1912_p9), %s341_s0, 1280  }
  0x97   : > { %1384 = vsyncadd (%p1912_p9), %s341_s0, 4294966016  ;;  %s1722_s2 = sand.u32 1, %s1399_s24   ;;  %p1913_p4 = scmp.ne.s32.totalorder %s1888_s16, 0 }
  0x98   : > { %s1000_s23 = smul.u32 48, %s1722_s2 }
  0x9a   : > { %s353_s17 = scalar_lea.vmem [#allocation13], %s1000_s23 }
  0x9b   : > { %1386 = dma.done.wait (%p1913_p4), %s341_s0, 768  }
  0x9c   : > { %1388 = vsyncadd (%p1913_p4), %s341_s0, 4294966528 }
  0x9d   : > { %358 = sfence }
  0x9e   : > { %v1142_v0 = vld [vmem:[%s353_s17 + $0x24] ss:$8 sps:$4 sm:$0xff]   ;;  %v1144_v1 = vld [vmem:[%s353_s17 + $0x20] ss:$8 sps:$4 sm:$0xff]   ;;  %v1446_v2 = vmov 0   ;;  %v1153_v6 = vld [vmem:[%s1715_s1 + $0x38] sm:$0xff]  }
  0x9f   : > { %503 = vmatprep.mubr.bf16.mxu0 %v1446_v2  ;;  %644 = vmatprep.subr.bf16.mxu1 %v1446_v2  ;;  %v1145_v3 = vld [vmem:[%s353_s17 + $0x14] ss:$8 sps:$4 sm:$0xff]   ;;  %v1147_v4 = vld [vmem:[%s353_s17 + $0x10] ss:$8 sps:$4 sm:$0xff]   ;;  %v1148_v5 = vld [vmem:[%s353_s17 + $0x4] ss:$8 sps:$4 sm:$0xff]  }
  0xa0   : > { %481 = vmatprep.subr.bf16.mxu0 %v1142_v0  ;;  %v1150_v7 = vld [vmem:[%s353_s17] ss:$8 sps:$4 sm:$0xff]   ;;  %645 = vmatpush1.bf16.msra.mxu1 %v1153_v6  ;;  %v1154_v8 = vld [vmem:[%s1715_s1 + $0x30] sm:$0xff]   ;;  %vm464_vm0 = vcmask 392192   ;;  %v1157_v13 = vld [vmem:[%s1715_s1 + $0x18] sm:$0xff]   ;;  %vm548_vm1 = vcmask 1043456  }
  0xa1   : > { %482 = vmatpush1.bf16.msra.mxu0 %v1144_v1  ;;  %v1151_v9 = vld [vmem:[%s1708_s8] sm:$0xff]   ;;  %646 = vmatprep.subr.bf16.mxu1 %v1446_v2  ;;  %v1155_v10 = vld [vmem:[%s1715_s1 + $0x28] sm:$0xff]   ;;  %v1158_v14 = vld [vmem:[%s1715_s1 + $0x10] sm:$0xff]   ;;  %vm549_vm2 = vcmask 261124   ;;  %vm637_vm4 = vcmask 261120   ;;  %s697_s6 = sld [smem:[#allocation3]] }
  0xa2   : > { %483 = vmatprep.subr.bf16.mxu0 %v1145_v3  ;;  %v1156_v11 = vld [vmem:[%s1715_s1 + $0x20] sm:$0xff]   ;;  %v1152_v12 = vld [vmem:[%s1708_s8 + $0x8] sm:$0xff]   ;;  %vm1741_vm3 = vmor %vm549_vm2, %vm548_vm1  ;;  %s951_s15 = sshll.u32 %s1722_s2, 5 }
  0xa3   : > { %v1159_v15 = vld [vmem:[%s1715_s1 + $0x8] sm:$0xff]   ;;  %v1160_v16 = vld [vmem:[%s1715_s1] sm:$0xff]   ;;  %s1754_s16 = scalar_lea.vmem [#allocation14], %s951_s15 }
  0xa4   : > { %647 = vmatpush1.bf16.msra.mxu1 %v1154_v8  ;;  %v1161_v17 = vld [vmem:[%s1715_s1 + $0x48] sm:$0xff]   ;;  %v1162_v18 = vld [vmem:[%s1715_s1 + $0x40] sm:$0xff]  }
  0xa5   : > { %484 = vmatpush1.bf16.msra.mxu0 %v1147_v4  ;;  %648 = vmatprep.subr.bf16.mxu1 %v1446_v2 }
  0xa6   : > { %485 = vmatprep.subr.bf16.mxu0 %v1148_v5 }
  0xa7   : > { %p982_p0 = scmp.eq.s32.totalorder %s697_s6, 0 }
  0xa8   : > { %649 = vmatpush1.bf16.msra.mxu1 %v1155_v10  ;;  %s1916_s19 = sld [smem:[#allocation22_spill]] (!%p982_p0) }
  0xa9   : > { %486 = vmatpush1.bf16.msra.mxu0 %v1150_v7  ;;  %650 = vmatprep.subr.bf16.mxu1 %v1446_v2  ;;  %s702_s21 = sld [smem:[#allocation4 + %s1423_s29]] (!%p982_p0) }
  0xac   : > { %960 = vmatmul.mubr.msk.bf16.vlgmr.msra.gmra.mxu0 %vm464_vm0, %v1151_v9  ;;  %651 = vmatpush1.bf16.msra.mxu1 %v1156_v11 }
  0xad   : > { %513 = vmatprep.mubr.bf16.mxu0 %v1446_v2  ;;  %652 = vmatprep.subr.bf16.mxu1 %v1446_v2 }
  0xae   : > { %s707_s12 = sshra.s32 (!%p982_p0), %s1916_s19, 7  ;;  %s712_s14 = sand.u32 (!%p982_p0), 127, %s1916_s19 }
  0xaf   : > { %s709_s22 = sadd.s32 (!%p982_p0), %s1423_s29, %s707_s12 }
  0xb0   : > { %653 = vmatpush1.bf16.msra.mxu1 %v1157_v13  ;;  %s983_s13 = sshll.u32 (!%p982_p0), %s709_s22, 7 }
  0xb1   : > { %654 = vmatprep.subr.bf16.mxu1 %v1446_v2  ;;  %s713_s9 = sadd.s32 (!%p982_p0), %s983_s13, %s712_s14 }
  0xb2   : > { %s714_s20 = sld [smem:[#allocation8 + %s713_s9]] (!%p982_p0) }
  0xb4   : > { %961 = vmatmul.mubr.msk.bf16.gmra.mxu0 %vm464_vm0, %v1152_v12  ;;  %655 = vmatpush1.bf16.msra.mxu1 %v1158_v14 }
  0xb5   : > { %656 = vmatprep.subr.bf16.mxu1 %v1446_v2 }
  0xb8   : > { %657 = vmatpush1.bf16.msra.mxu1 %v1159_v15 }
  0xb9   : > { %658 = vmatprep.subr.bf16.mxu1 %v1446_v2 }
  0xbc   : > { %659 = vmatpush1.bf16.msra.mxu1 %v1160_v16 }
  0xbd   : > { %672 = vmatprep.subr.bf16.mxu1 %v1446_v2 }
  0xc0   : > { %673 = vmatpush2.bf16.msra.mxu1 %v1161_v17 }
  0xc1   : > { %674 = vmatprep.subr.bf16.mxu1 %v1446_v2 }
  0xc4   : > { %675 = vmatpush2.bf16.msra.mxu1 %v1162_v18 }
 0x16c   : > { %v505_v19 = vpop.f32.mrf.mxu0 }
 0x16e   : > { %v507_v20 = vpop.f32.mrf.mxu0 }
 0x16f   : > { %v990_v22 = vpack.c.bf16 %v507_v20, %v505_v19 }
 0x170   : > { %v509_v23 = vpop.f32.mrf.mxu0 }
 0x171   : > { %551 = vst.msk [vmem:[#allocation2] sm:$0xff] %vm1741_vm3, %v990_v22 }
 0x172   : > { %v511_v24 = vpop.f32.mrf.mxu0 }
 0x173   : > { %v991_v25 = vpack.c.bf16 %v511_v24, %v509_v23 }
 0x174   : > { %v515_v26 = vpop.f32.mrf.mxu0 }
 0x175   : > { %552 = vst.msk [vmem:[#allocation2 + $0x8] sm:$0xff] %vm1741_vm3, %v991_v25 }
 0x176   : > { %v517_v27 = vpop.f32.mrf.mxu0 }
 0x177   : > { %v992_v28 = vpack.c.bf16 %v517_v27, %v515_v26 }
 0x178   : > { %v519_v29 = vpop.f32.mrf.mxu0 }
 0x179   : > { %553 = vst.msk [vmem:[#allocation2 + $0x10] sm:$0xff] %vm1741_vm3, %v992_v28 }
 0x17a   : > { %v521_v30 = vpop.f32.mrf.mxu0 }
 0x17b   : > { %v993_v31 = vpack.c.bf16 %v521_v30, %v519_v29 }
 0x17c   : > { %v1163_v32 = vld [vmem:[#allocation2] ss:$8 sps:$4 sm:$0xff]   ;;  %v1165_v33 = vld [vmem:[#allocation2 + $0x4] ss:$8 sps:$4 sm:$0xff]  }
 0x17d   : > { %554 = vst.msk [vmem:[#allocation2 + $0x18] sm:$0xff] %vm1741_vm3, %v993_v31  ;;  %980 = vmatprep.mubr.msk.bf16.mxu1 %vm637_vm4, %v1165_v33 }
 0x17e   : > { %677 = vmatmul.mubr.bf16.vlgmr.msra.gmra.mxu1 %v1163_v32 }
 0x184   : > { %v1166_v34 = vld [vmem:[#allocation2 + $0x14] ss:$8 sps:$4 sm:$0xff]   ;;  %v1168_v35 = vld [vmem:[#allocation2 + $0x10] ss:$8 sps:$4 sm:$0xff]  }
 0x185   : > { %981 = vmatprep.mubr.msk.bf16.mxu1 %vm637_vm4, %v1166_v34 }
 0x186   : > { %685 = vmatmul.mubr.bf16.gmra.mxu1 %v1168_v35 }
 0x23e   : > { %v678_v36 = vpop.f32.mrf.mxu1 }
 0x23f   : > { %693 = vst [vmem:[%s1754_s16] sm:$0xff] %v678_v36 }
 0x240   : > { %v680_v37 = vpop.f32.mrf.mxu1 }
 0x242   : > { %v681_v38 = vpop.f32.mrf.mxu1 }
 0x243   : > { %694 = vst [vmem:[%s1754_s16 + $0x8] sm:$0xff] %v681_v38 }
 0x244   : > { %v683_v39 = vpop.f32.mrf.mxu1 }
 0x246   : > { %v686_v40 = vpop.f32.mrf.mxu1 }
 0x247   : > { %695 = vst [vmem:[%s1754_s16 + $0x10] sm:$0xff] %v686_v40 }
 0x248   : > { %v688_v41 = vpop.f32.mrf.mxu1  ;;  %701 = sbr.rel (%p982_p0) target bundleno = 639 (0x27f), region = 68 }
 0x24a   : > { %v689_v42 = vpop.f32.mrf.mxu1 }
 0x24b   : > { %696 = vst [vmem:[%s1754_s16 + $0x18] sm:$0xff] %v689_v42 }
 0x24c   : > { %v691_v43 = vpop.f32.mrf.mxu1 }
 0x24d   : > { %v703_v44 = vld [vmem:[%s1754_s16] sm:$0xff]  ;;  %v704_v45 = vld [vmem:[%s1754_s16 + $0x8] sm:$0xff]  ;;  %v731_v53 = vstv %s702_s21  ;;  %v748_v5 = vstv %s714_s20 }
 0x24e   : > { %v705_v46 = vld [vmem:[%s1754_s16 + $0x10] sm:$0xff]  ;;  %vm715_vm5 = vcmp.gt.f32.partialorder %v703_v44, 0.0  ;;  %vm716_vm6 = vcmp.gt.f32.partialorder %v704_v45, 0.0 }
 0x24f   : > { %vm717_vm7 = vcmp.gt.f32.partialorder %v705_v46, 0.0  ;;  %v719_v48 = vsel %vm715_vm5, %v703_v44, 1.0  ;;  %v720_v49 = vsel %vm716_vm6, %v704_v45, 1.0 }
 0x250   : > { %v721_v50 = vsel %vm717_vm7, %v705_v46, 1.0  ;;  %1169 = vlog2.f32 %v719_v48 }
 0x251   : > { %1171 = vlog2.f32 %v720_v49 }
 0x252   : > { %v706_v47 = vld [vmem:[%s1754_s16 + $0x18] sm:$0xff]  ;;  %1173 = vlog2.f32 %v721_v50 }
 0x253   : > { %vm718_vm8 = vcmp.gt.f32.partialorder %v706_v47, 0.0 }
 0x254   : > { %v722_v51 = vsel %vm718_vm8, %v706_v47, 1.0 }
 0x255   : > { %1175 = vlog2.f32 %v722_v51 }
 0x25d   : > { %v1170_v52 = vpop.eup %1169 }
 0x25e   : > { %v1172_v54 = vpop.eup %1171  ;;  %v724_v55 = vmul.f32 0.6931472, %v1170_v52 }
 0x25f   : > { %v1174_v56 = vpop.eup %1173  ;;  %v726_v57 = vmul.f32 0.6931472, %v1172_v54 }
 0x260   : > { %v732_v59 = vmul.f32 %v731_v53, %v724_v55  ;;  %v728_v60 = vmul.f32 0.6931472, %v1174_v56 }
 0x261   : > { %v733_v61 = vmul.f32 %v731_v53, %v726_v57 }
 0x262   : > { %v1176_v58 = vpop.eup %1175  ;;  %v736_v63 = vmul.f32 1.442695, %v732_v59  ;;  %v734_v0 = vmul.f32 %v731_v53, %v728_v60 }
 0x263   : > { %v730_v62 = vmul.f32 0.6931472, %v1176_v58  ;;  %v738_v1 = vmul.f32 1.442695, %v733_v61 }
 0x264   : > { %1177 = vpow2.f32 %v736_v63  ;;  %v740_v3 = vmul.f32 1.442695, %v734_v0 }
 0x265   : > { %v735_v2 = vmul.f32 %v731_v53, %v730_v62  ;;  %1179 = vpow2.f32 %v738_v1 }
 0x266   : > { %1181 = vpow2.f32 %v740_v3 }
 0x267   : > { %v742_v4 = vmul.f32 1.442695, %v735_v2 }
 0x269   : > { %1183 = vpow2.f32 %v742_v4 }
 0x271   : > { %v1178_v6 = vpop.eup %1177 }
 0x272   : > { %v1180_v7 = vpop.eup %1179  ;;  %v744_v8 = vsel %vm715_vm5, %v1178_v6, 0.0 }
 0x273   : > { %v1182_v9 = vpop.eup %1181  ;;  %v749_v10 = vmul.f32 %v748_v5, %v744_v8  ;;  %v745_v11 = vsel %vm716_vm6, %v1180_v7, 0.0 }
 0x274   : > { %v750_v13 = vmul.f32 %v748_v5, %v745_v11  ;;  %v746_v14 = vsel %vm717_vm7, %v1182_v9, 0.0 }
 0x275   : > { %v753_v15 = vmax.f32 %v749_v10, 0.0  ;;  %v751_v16 = vmul.f32 %v748_v5, %v746_v14 }
 0x276   : > { %v1184_v12 = vpop.eup %1183  ;;  %v754_v18 = vmax.f32 %v750_v13, 0.0 }
 0x277   : > { %v747_v17 = vsel %vm718_vm8, %v1184_v12, 0.0  ;;  %v757_v20 = vmin.f32 %v753_v15, 1.0  ;;  %v755_v21 = vmax.f32 %v751_v16, 0.0 }
 0x278   : > { %v752_v19 = vmul.f32 %v748_v5, %v747_v17  ;;  %v758_v22 = vmin.f32 %v754_v18, 1.0 }
 0x279   : > { %761 = vst [vmem:[%s1754_s16] sm:$0xff] %v757_v20  ;;  %v759_v24 = vmin.f32 %v755_v21, 1.0 }
 0x27a   : > { %v756_v23 = vmax.f32 %v752_v19, 0.0  ;;  %762 = vst [vmem:[%s1754_s16 + $0x8] sm:$0xff] %v758_v22 }
 0x27b   : > { %763 = vst [vmem:[%s1754_s16 + $0x10] sm:$0xff] %v759_v24 }
 0x27c   : > { %v760_v25 = vmin.f32 %v756_v23, 1.0 }
 0x27e   : > { %764 = vst [vmem:[%s1754_s16 + $0x18] sm:$0xff] %v760_v25 }
 0x27f PF: > { %s1917_s8 = sld [smem:[#allocation22_spill]]  ;;  %s1001_s0 = smul.u32 24, %s1423_s29 }
 0x280   : > { %s1918_s18 = sld [smem:[#allocation24_spill]]  ;;  %s781_s1 = sshll.u32 %s1754_s16, 4  ;;  %s1783_s1 = int_to_ptr.vmem [resolvable:$true] %s781_s1 }
 0x281   : > { %s1919_s19 = sld [smem:[#allocation30_spill]]  ;;  %s766_s12 = scalar_lea.sflag [#allocation6], %s1722_s2 }
 0x282   : > { %s1299_s22 = scalar_lea.vmem %s1783_s1, 512  ;;  %s1447_s29 = smov [#allocation14]  }
 0x283   : > { %p1300_p7 = scmp.ne.s32.totalorder %s1783_s1, %s1299_s22  ;;  %s1303_s16 = sshll.u32 %s1447_s29, 4  ;;  %s1304_s16 = int_to_ptr.vmem [resolvable:$false] %s1303_s16 }
 0x284   : > { %s1305_s13 = scalar_lea.vmem %s1304_s16, 1024  ;;  %p1306_p8 = scmp.lt.s32.totalorder %s1783_s1, %s1304_s16 }
 0x285   : > { %s985_s4 = sshll.u32 %s1917_s8, 2  ;;  %p1307_p2 = scmp.lt.s32.totalorder %s1305_s13, %s1299_s22 }
 0x286   : > { %s778_s23 = sadd.s32 %s1001_s0, %s985_s4  ;;  %p1920_p10 = scmp.ne.s32.totalorder %s1918_s18, 0 }
 0x287   : > { %s986_s17 = sshll.u32 %s778_s23, 7  ;;  %p1308_p6 = por %p1307_p2, %p1306_p8 }
 0x288   : > { %s1788_s21 = scalar_lea.hbm %s1919_s19, %s986_s17  ;;  %p1301_p11 = pnand %p1300_p7, %p1920_p10 }
 0x28a   : > { %p1302_p13 = pneg %p1301_p11 }
 0x28c   : > { %p1309_p12 = pnand %p1308_p6, %p1302_p13 }
 0x28e   : > { %1312 = shalt.err (!%p1309_p12)
}
 0x28f   : > { %s1313_s14 = scalar_lea.hbm %s1788_s21, 512  ;;  %s1317_s8 = scalar_lea.hbm %s1919_s19, 6144 }
 0x290   : > { %p1314_p3 = scmp.ne.s32.totalorder %s1788_s21, %s1313_s14  ;;  %p1318_p9 = scmp.lt.s32.totalorder %s1788_s21, %s1919_s19 }
 0x291   : > { %p1319_p4 = scmp.lt.s32.totalorder %s1317_s8, %s1313_s14 }
 0x292   : > { %p1315_p1 = pnand %p1314_p3, %p1920_p10 }
 0x293   : > { %p1320_p0 = por %p1319_p4, %p1318_p9 }
 0x294   : > { %p1316_p5 = pneg %p1315_p1 }
 0x296   : > { %p1321_p7 = pnand %p1320_p0, %p1316_p5 }
 0x298   : > { %1324 = shalt.err (!%p1321_p7)
}
 0x299   : > { %s1448_s23 = smov 128   ;;  %s1449_s17 = smov 8  }
 0x29a   : > { %1016 = dma.vmem_to_hbm [thread:$0]  (%p1920_p10), %s1783_s1, 512, %s1788_s21, %s766_s12, %s1448_s23, %s1448_s23, %s1449_s17  }
 0x29b PF: > { %s1921_s6 = sld [smem:[#allocation23_spill]] }
 0x29c   : > { %s1922_s15 = sld [smem:[#allocation21_spill]] }
 0x29d   : > { %s1923_s22 = sld [smem:[#allocation25_spill]] }
 0x2a1   : > { %p1044_p11 = scmp.ge.s32.totalorder %s1921_s6, 2 }
 0x2a2   : > { %s796_s29 = sand.u32 1, %s1922_s15  }
 0x2a3   : > { %p1924_p13 = scmp.ne.s32.totalorder %s1923_s22, 0  ;;  %s797_s16 = scalar_lea.sflag [#allocation6], %s796_s29 }
 0x2a5   : > { %p1036_p8 = pnand %p1044_p11, %p1924_p13 }
 0x2a7   : > { %p1037_p2 = pneg %p1036_p8 }
 0x2a9   : > { %1390 = dma.done.wait (%p1037_p2), %s797_s16, 512  }
 0x2aa   : > { %1392 = vsyncadd (%p1037_p2), %s797_s16, 4294966784  ;;  %s28_s8 = sadd.s32 1, %s1921_s6   ;;  %s1925_s2 = smov %s1681_s26 }
 0x2ab   : > { %p25_p6 = scmp.ge.s32.totalorder %s28_s8, 14   ;;  %s1926_s23 = smov %s1399_s24 }
 0x2ac   : > { %s1927_s24 = smov %s1403_s25  ;;  %s1928_s25 = smov %s1686_s3 }
 0x2ad   : > { %s1929_s26 = smov %s1411_s27  ;;  %s1930_s27 = smov %s1415_s28 }
 0x2ae   : > { %s1931_s28 = smov %s1925_s2  ;;  %s1932_s2 = smov %s1427_s30 }
 0x2af   : > { %s1933_s29 = smov %s1431_s7  ;;  %s1934_s30 = smov %s1937_s11 }
 0x2b0   : > { %s1935_s7 = smov %s1941_s10  ;;  %27 = sbr.rel (!%p25_p6) target bundleno = 20 (0x14), region = 126 }
 0x2b5   :  { %802 = vsyncpa [#allocation5], 1 }
 0x2b6   :  { %804 = vsyncpa [#allocation5 + $0x1], 1 }
 0x2b7   :  { %805 = vsyncpa [#allocation12], 1 }
 0x2b8   :  { %807 = vsyncpa [#allocation12 + $0x1], 1 }
 0x2b9   :  { %808 = vsyncpa [#allocation6], 1 }
 0x2ba   :  { %810 = vsyncpa [#allocation6 + $0x1], 1 }
 0x2bb   :  { %811 = vsyncpa [#allocation7], 1 }
 0x2bc   :  { %813 = vsyncpa [#allocation7 + $0x1], 1 }
 0x2bd   :  { %814 = vsyncpa [#allocation9], 1 }

</bundles_post_ra>
